<compile_context>
chip_gen: v7x
topology: tpu7x:2x2x1
jax: 0.10.0
libtpu: 0.0.40
codegen_flags: <defaults>
</compile_context>

<pallas_src>
import math

import jax
import jax.numpy as jnp
from jax import lax
from jax.experimental import pallas as pl
from jax.experimental.pallas import tpu as pltpu

F_IN, F_HID, F_OUT = 6, 8, 6


def lebrs_kernel(x_ref, w1_ref, b1_ref, w2_ref, b2_ref, w3_ref, b3_ref, o_ref):
    # x block: (TB, 6) batch-major, exactly as stored in HBM (no wrapper relayout).
    x = x_ref[...]
    # Layer 1: contract the 6-wide feature axis of both operands (Q@K^T pattern),
    # producing hidden activations feature-major (8, TB): features on sublanes,
    # batch on the 128-wide lane axis.  Any relayout Mosaic inserts for the
    # narrow x tile rides the otherwise-idle XLU/MXU slots.
    h = lax.dot_general(w1_ref[...], x, (((1,), (1,)), ((), ())),
                        preferred_element_type=jnp.float32)        # (8, TB)
    h = jnp.maximum(h + b1_ref[...], 0.0)                          # bias (8,1) over lanes
    # Layer 2: plain (8,8) @ (8,TB) MXU matmul, stays feature-major / lane-dense.
    h = jnp.dot(w2_ref[...], h, preferred_element_type=jnp.float32)
    h = jnp.maximum(h + b2_ref[...], 0.0)
    # Layer 3: contract the 8-wide feature axis of both operands (A^T @ B form),
    # producing the result batch-major (TB, 6) so it stores straight into the
    # output block -- no wrapper-side back-transpose.
    y = lax.dot_general(h, w3_ref[...], (((0,), (0,)), ((), ())),
                        preferred_element_type=jnp.float32)        # (TB, 6)
    o_ref[...] = jnp.maximum(y + b3_ref[...], 0.0).astype(o_ref.dtype)


def _round_up(n, m):
    return ((n + m - 1) // m) * m


def lebrs_forward(x, params, tile_b=8192):
    """x: (B, 6) float32 -> (B, 6) float32. params as produced by init_params."""
    B = x.shape[0]
    assert x.shape[1] == F_IN, x.shape

    # One-time, tiny param reorientation (48-64 floats each).
    w1t = params["w1"].T                      # (8, 6) = (out, in)
    w2t = params["w2"].T                      # (8, 8) = (out, in)
    w3 = params["w3"]                         # (8, 6) = (in, out)
    b1 = params["b1"].reshape(F_HID, 1)       # (8, 1): broadcast over lanes (batch)
    b2 = params["b2"].reshape(F_HID, 1)       # (8, 1)
    b3 = params["b3"].reshape(1, F_OUT)       # (1, 6): broadcast over sublanes (batch)

    # Batch tile = second-minor dim of the (TB, 6) blocks, so legality only needs
    # a multiple of 8; use multiples of 128 for large B so the feature-major
    # (8, TB) intermediates are whole vregs.  Derived from B (small tail waste),
    # capped so the double-buffered in+out VMEM blocks (lane-padded to (TB, 128)
    # f32) stay ~<= 16 MiB, and split into >= 2 tiles when B allows so the
    # "parallel" axis shards across both v7x TensorCores.
    tile_cap = max(128, _round_up(int(tile_b), 128))   # round caller tile to 128
    if B <= tile_cap:
        b_tile = _round_up(B, 8)              # single (usually exact) block
    else:
        b128 = _round_up(B, 128)
        n_pairs = max(1, pl.cdiv(b128, 2 * tile_cap))
        b_tile = _round_up(pl.cdiv(b128, 2 * n_pairs), 128)
    n_tiles = pl.cdiv(B, b_tile)

    resident = lambda a: pl.BlockSpec(a.shape, lambda i: (0, 0))  # DMA'd once, stays in VMEM

    return pl.pallas_call(
        lebrs_kernel,
        out_shape=jax.ShapeDtypeStruct((B, F_OUT), x.dtype),
        grid=(n_tiles,),
        in_specs=[
            pl.BlockSpec((b_tile, F_IN), lambda i: (i, 0)),
            resident(w1t), resident(b1),
            resident(w2t), resident(b2),
            resident(w3), resident(b3),
        ],
        out_specs=pl.BlockSpec((b_tile, F_OUT), lambda i: (i, 0)),
        compiler_params=pltpu.CompilerParams(
            dimension_semantics=("parallel",),
            # 2x double-buffered (b_tile, 128)-padded f32 in/out blocks plus the
            # small feature-major temporaries: ~20 MiB at b_tile=8192.  48 MiB is
            # safely inside physical VMEM on v5e/v6e (128 MiB) and v7x (64 MiB),
            # and above v5e's 16 MiB scoped default.
            vmem_limit_bytes=48 * 1024 * 1024,
        ),
    )(x, w1t, b1, w2t, b2, w3, b3)


def init_params(key):
    """Deterministic init mirroring nn.Linear's default (Kaiming-uniform style)."""
    def linear_init(k, fan_in, fan_out):
        k_w, k_b = jax.random.split(k)
        bound = 1.0 / math.sqrt(fan_in)
        w = jax.random.uniform(k_w, (fan_in, fan_out), jnp.float32, -bound, bound)
        b = jax.random.uniform(k_b, (1, fan_out), jnp.float32, -bound, bound)
        return w, b

    k1, k2, k3 = jax.random.split(key, 3)
    w1, b1 = linear_init(k1, 6, 8)
    w2, b2 = linear_init(k2, 8, 8)
    w3, b3 = linear_init(k3, 8, 6)
    return dict(w1=w1, b1=b1, w2=w2, b2=b2, w3=w3, b3=b3)


def lebrs_reference(x, params):
    h = jnp.maximum(x @ params["w1"] + params["b1"], 0.0)
    h = jnp.maximum(h @ params["w2"] + params["b2"], 0.0)
    h = jnp.maximum(h @ params["w3"] + params["b3"], 0.0)
    return h


if __name__ == "__main__":
    key = jax.random.PRNGKey(0)
    k_x, k_p = jax.random.split(key)
    params = init_params(k_p)

    # 1) Tiny batch: single exact (8, 6) block.
    B = 8
    x = jax.random.normal(k_x, (B, F_IN), jnp.float32)
    out = jax.block_until_ready(lebrs_forward(x, params))
    ref = lebrs_reference(x, params)
    assert out.shape == (B, F_OUT), out.shape
    assert jnp.allclose(out, ref, atol=1e-5, rtol=1e-5), "mismatch vs reference (B=8)"

    # 2) Medium batch, not a multiple of 128: single exact (200, 6) block.
    B2 = 200
    x2 = jax.random.normal(jax.random.PRNGKey(1), (B2, F_IN), jnp.float32)
    out2 = jax.block_until_ready(lebrs_forward(x2, params))
    ref2 = lebrs_reference(x2, params)
    assert out2.shape == (B2, F_OUT), out2.shape
    assert jnp.allclose(out2, ref2, atol=1e-5, rtol=1e-5), "mismatch vs reference (B=200)"

    # 3) Small tile cap to exercise the multi-tile grid, resident weights across
    #    grid steps, and a ragged partial last block (300 rows, 128-row tiles).
    B3 = 300
    x3 = jax.random.normal(jax.random.PRNGKey(2), (B3, F_IN), jnp.float32)
    out3 = jax.block_until_ready(lebrs_forward(x3, params, tile_b=128))
    ref3 = lebrs_reference(x3, params)
    assert out3.shape == (B3, F_OUT), out3.shape
    assert jnp.allclose(out3, ref3, atol=1e-5, rtol=1e-5), "mismatch vs reference (B=300)"

    print("KERNEL_OK")
</pallas_src>

<mosaic_0001>
module attributes {stable_mosaic.version = 11 : i64} {
  func.func @lebrs_kernel(%arg0: i32, %arg1: memref<8x6xf32, #tpu.memory_space<vmem>>, %arg2: memref<8x6xf32, #tpu.memory_space<vmem>>, %arg3: memref<8x1xf32, #tpu.memory_space<vmem>>, %arg4: memref<8x8xf32, #tpu.memory_space<vmem>>, %arg5: memref<8x1xf32, #tpu.memory_space<vmem>>, %arg6: memref<8x6xf32, #tpu.memory_space<vmem>>, %arg7: memref<1x6xf32, #tpu.memory_space<vmem>>, %arg8: memref<8x6xf32, #tpu.memory_space<vmem>>) attributes {dimension_semantics = [#tpu.dimension_semantics<parallel>], iteration_bounds = array<i64: 1>, scalar_prefetch = 0 : i64, scratch_operands = 0 : i64, tpu.core_type = #tpu.core_type<tc>, window_params = [{transform_indices = @transform_0, window_bounds = array<i64: 8, 6>}, {pipeline_mode = #tpu.pipeline_mode<synchronous>, transform_indices = @transform_1, window_bounds = array<i64: 8, 6>}, {pipeline_mode = #tpu.pipeline_mode<synchronous>, transform_indices = @transform_2, window_bounds = array<i64: 8, 1>}, {pipeline_mode = #tpu.pipeline_mode<synchronous>, transform_indices = @transform_3, window_bounds = array<i64: 8, 8>}, {pipeline_mode = #tpu.pipeline_mode<synchronous>, transform_indices = @transform_4, window_bounds = array<i64: 8, 1>}, {pipeline_mode = #tpu.pipeline_mode<synchronous>, transform_indices = @transform_5, window_bounds = array<i64: 8, 6>}, {pipeline_mode = #tpu.pipeline_mode<synchronous>, transform_indices = @transform_6, window_bounds = array<i64: 1, 6>}, {transform_indices = @transform_7, window_bounds = array<i64: 8, 6>}]} {
    %c0 = arith.constant 0 : index
    %c0_0 = arith.constant 0 : index
    %0 = vector.load %arg1[%c0, %c0_0] : memref<8x6xf32, #tpu.memory_space<vmem>>, vector<8x6xf32>
    %c0_1 = arith.constant 0 : index
    %c0_2 = arith.constant 0 : index
    %1 = vector.load %arg2[%c0_1, %c0_2] : memref<8x6xf32, #tpu.memory_space<vmem>>, vector<8x6xf32>
    %cst = arith.constant dense<0.000000e+00> : vector<8x8xf32>
    %2 = tpu.matmul %1, %0, %cst {dimension_numbers = #tpu.dot_dimension_numbers<[1], [1], [0], [0], [0, 0, 1, 0], [], []>} : vector<8x6xf32>, vector<8x6xf32>, vector<8x8xf32> -> vector<8x8xf32>
    %c0_3 = arith.constant 0 : index
    %c0_4 = arith.constant 0 : index
    %3 = vector.load %arg3[%c0_3, %c0_4] : memref<8x1xf32, #tpu.memory_space<vmem>>, vector<8x1xf32>
    %4 = vector.broadcast %3 : vector<8x1xf32> to vector<8x8xf32>
    %5 = arith.addf %2, %4 : vector<8x8xf32>
    %cst_5 = arith.constant 0.000000e+00 : f32
    %6 = vector.broadcast %cst_5 : f32 to vector<8x8xf32>
    %7 = arith.maximumf %5, %6 : vector<8x8xf32>
    %c0_6 = arith.constant 0 : index
    %c0_7 = arith.constant 0 : index
    %8 = vector.load %arg4[%c0_6, %c0_7] : memref<8x8xf32, #tpu.memory_space<vmem>>, vector<8x8xf32>
    %cst_8 = arith.constant dense<0.000000e+00> : vector<8x8xf32>
    %9 = tpu.matmul %8, %7, %cst_8 {dimension_numbers = #tpu.dot_dimension_numbers<[1], [0], [0], [1], [0, 0, 1, 1], [], []>} : vector<8x8xf32>, vector<8x8xf32>, vector<8x8xf32> -> vector<8x8xf32>
    %c0_9 = arith.constant 0 : index
    %c0_10 = arith.constant 0 : index
    %10 = vector.load %arg5[%c0_9, %c0_10] : memref<8x1xf32, #tpu.memory_space<vmem>>, vector<8x1xf32>
    %11 = vector.broadcast %10 : vector<8x1xf32> to vector<8x8xf32>
    %12 = arith.addf %9, %11 : vector<8x8xf32>
    %cst_11 = arith.constant 0.000000e+00 : f32
    %13 = vector.broadcast %cst_11 : f32 to vector<8x8xf32>
    %14 = arith.maximumf %12, %13 : vector<8x8xf32>
    %c0_12 = arith.constant 0 : index
    %c0_13 = arith.constant 0 : index
    %15 = vector.load %arg6[%c0_12, %c0_13] : memref<8x6xf32, #tpu.memory_space<vmem>>, vector<8x6xf32>
    %cst_14 = arith.constant dense<0.000000e+00> : vector<8x6xf32>
    %16 = tpu.matmul %14, %15, %cst_14 {dimension_numbers = #tpu.dot_dimension_numbers<[0], [0], [1], [1], [0, 1, 1, 1], [], []>} : vector<8x8xf32>, vector<8x6xf32>, vector<8x6xf32> -> vector<8x6xf32>
    %c0_15 = arith.constant 0 : index
    %c0_16 = arith.constant 0 : index
    %17 = vector.load %arg7[%c0_15, %c0_16] : memref<1x6xf32, #tpu.memory_space<vmem>>, vector<1x6xf32>
    %18 = vector.broadcast %17 : vector<1x6xf32> to vector<8x6xf32>
    %19 = arith.addf %16, %18 : vector<8x6xf32>
    %cst_17 = arith.constant 0.000000e+00 : f32
    %20 = vector.broadcast %cst_17 : f32 to vector<8x6xf32>
    %21 = arith.maximumf %19, %20 : vector<8x6xf32>
    %c0_18 = arith.constant 0 : index
    %c0_19 = arith.constant 0 : index
    %22 = vector.load %arg8[%c0_18, %c0_19] : memref<8x6xf32, #tpu.memory_space<vmem>>, vector<8x6xf32>
    tpu.vector_store %arg8[%c0_18, %c0_19], %21 {strides = array<i32>} : memref<8x6xf32, #tpu.memory_space<vmem>>, vector<8x6xf32>,
    return
  }
  func.func @transform_0(%arg0: i32) -> (i32, i32) {
    %c0_i32 = arith.constant 0 : i32
    %c0_i32_0 = arith.constant 0 : i32
    return %arg0, %c0_i32 : i32, i32
  }
  func.func @transform_1(%arg0: i32) -> (i32, i32) {
    %c0_i32 = arith.constant 0 : i32
    %c0_i32_0 = arith.constant 0 : i32
    %c0_i32_1 = arith.constant 0 : i32
    return %c0_i32, %c0_i32_0 : i32, i32
  }
  func.func @transform_2(%arg0: i32) -> (i32, i32) {
    %c0_i32 = arith.constant 0 : i32
    %c0_i32_0 = arith.constant 0 : i32
    %c0_i32_1 = arith.constant 0 : i32
    return %c0_i32, %c0_i32_0 : i32, i32
  }
  func.func @transform_3(%arg0: i32) -> (i32, i32) {
    %c0_i32 = arith.constant 0 : i32
    %c0_i32_0 = arith.constant 0 : i32
    %c0_i32_1 = arith.constant 0 : i32
    return %c0_i32, %c0_i32_0 : i32, i32
  }
  func.func @transform_4(%arg0: i32) -> (i32, i32) {
    %c0_i32 = arith.constant 0 : i32
    %c0_i32_0 = arith.constant 0 : i32
    %c0_i32_1 = arith.constant 0 : i32
    return %c0_i32, %c0_i32_0 : i32, i32
  }
  func.func @transform_5(%arg0: i32) -> (i32, i32) {
    %c0_i32 = arith.constant 0 : i32
    %c0_i32_0 = arith.constant 0 : i32
    %c0_i32_1 = arith.constant 0 : i32
    return %c0_i32, %c0_i32_0 : i32, i32
  }
  func.func @transform_6(%arg0: i32) -> (i32, i32) {
    %c0_i32 = arith.constant 0 : i32
    %c0_i32_0 = arith.constant 0 : i32
    %c0_i32_1 = arith.constant 0 : i32
    return %c0_i32, %c0_i32_0 : i32, i32
  }
  func.func @transform_7(%arg0: i32) -> (i32, i32) {
    %c0_i32 = arith.constant 0 : i32
    %c0_i32_0 = arith.constant 0 : i32
    return %arg0, %c0_i32 : i32, i32
  }
}

</mosaic_0001>

<bundles_post_ra>
// kernel: tpu_custom_call.1
= control target key start
LH: loop header
LB: loop body
LE: loop exit
PB: predicated region body
PF: predicated region fallthrough
CT: control target
= control target key end

     0   :  { %vm35_vm0 = vcmask 48128   ;;  %v379_v1 = vmov 0.0   ;;  %vm380_vm1 = vmmov 0   ;;  %s462_s0 = inlined_call_operand.vmem [shape: f32[8,6], index: 0, kind: input, shape index: {}]   ;;  %s463_s1 = inlined_call_operand.vmem [shape: f32[8,6], index: 1, kind: input, shape index: {}]   ;;  %s464_s2 = inlined_call_operand.vmem [shape: f32[8,1], index: 2, kind: input, shape index: {}]   ;;  %s465_s3 = inlined_call_operand.vmem [shape: f32[8,8], index: 3, kind: input, shape index: {}]   ;;  %s466_s4 = inlined_call_operand.vmem [shape: f32[8,1], index: 4, kind: input, shape index: {}]   ;;  %s467_s5 = inlined_call_operand.vmem [shape: f32[8,6], index: 5, kind: input, shape index: {}]   ;;  %s468_s6 = inlined_call_operand.vmem [shape: f32[1,6], index: 6, kind: input, shape index: {}]   ;;  %s469_s7 = inlined_call_operand.hbm [shape: f32[8,6], index: 7, kind: output, shape index: {}]  }
   0x1   :  { %v27_v0 = vld [vmem:[%s462_s0] sm:$0xff]  ;;  %335 = vmatprep.subr.mxu0 %v379_v1  ;;  %337 = vmatprep.mubr.msk.f32.mxu0 %vm380_vm1, %v379_v1 }
   0x2   :  { %v29_v2 = vld [vmem:[%s464_s2] sm:$0xff] }
   0x3   :  { %12 = vsyncpa [#allocation3], 0  ;;  %336 = vmatpush3.xpose.msk.msra.mxu0 %vm35_vm0, %v27_v0  ;;  %v28_v3 = vld [vmem:[%s463_s1] sm:$0xff]  ;;  %v381_v4 = vmov 0   ;;  %340 = vmatprep.subr.mxu1 %v379_v1  ;;  %vm120_vm2 = vcmask 64512   ;;  %s382_s10 = smov [#allocation2]  }
   0x4   :  { %354 = vset.pattern.permute.xlu0 %v381_v4  ;;  %v114_v5 = vld [vmem:[%s466_s4] sm:$0xff]  ;;  %342 = vmatprep.mubr.msk.f32.mxu1 %vm380_vm1, %v379_v1  ;;  %s316_s11 = sshll.u32 %s382_s10, 4  ;;  %s317_s11 = int_to_ptr.vmem [resolvable:$true] %s316_s11 }
   0x5   :  { %32 = vperm.xlu0 %354, %v29_v2   ;;  %v113_v11 = vld [vmem:[%s465_s3] sm:$0xff]  ;;  %p360_p1 = scmp.lt.s32.totalorder %s317_s11, %s317_s11 }
   0x6   :  { %338 = vmatmul.mubr.msk.f32.vlgmr.msra.gmra.mrb[0].mxu0 %vm35_vm0, %v28_v3  ;;  %v195_v12 = vld [vmem:[%s467_s5] sm:$0xff]  ;;  %s355_s5 = scalar_lea.vmem %s317_s11, 128 }
   0x7   :  { %v327_v19 = vld [vmem:[%s468_s6] ss:$0 sm:$0xff]  ;;  %p356_p0 = scmp.ne.s32.totalorder %s317_s11, %s355_s5  ;;  %p361_p2 = scmp.lt.s32.totalorder %s355_s5, %s355_s5 }
   0x9   :  { %117 = vperm.xlu0 %354, %v114_v5   ;;  %p362_p3 = por %p361_p2, %p360_p1 }
   0xb   :  { %p363_p4 = pnand %p362_p3, %p356_p0 }
  0x84   :  { %v33_v6 = vpop.permute.xlu0 %32 }
  0x88   :  { %v118_v13 = vpop.permute.xlu0 %117 }
  0xd9   :  { %v108_v7 = vpop.f32.mrb[0].mxu0 }
  0xda   :  { %v109_v8 = vadd.f32 %v108_v7, %v33_v6  ;;  %v339_v9 = vpop.f32.mrb[1].mxu0 }
  0xdc   :  { %v112_v10 = vmax.f32 %v109_v8, 0.0 }
  0xde   :  { %341 = vmatpush3.msra.mxu1 %v112_v10 }
  0xdf   :  { %343 = vmatmul.mubr.msk.f32.vlgmr.msra.gmra.mrb[0].mxu1 %vm120_vm2, %v113_v11  ;;  %345 = vmatprep.subr.mxu1 %v379_v1 }
  0xe0   :  { %347 = vmatprep.mubr.msk.f32.mxu1 %vm380_vm1, %v379_v1  ;;  %346 = vmatpush3.msra.mxu1 %v195_v12 }
 0x1b2   :  { %v190_v14 = vpop.f32.mrb[0].mxu1 }
 0x1b3   :  { %v344_v15 = vpop.f32.mrb[1].mxu1  ;;  %v191_v16 = vadd.f32 %v190_v14, %v118_v13 }
 0x1b5   :  { %v194_v17 = vmax.f32 %v191_v16, 0.0 }
 0x1b7   :  { %203 = vxpose.xlu1.b32.start.end [1/1] (short) (narrow) %v194_v17, 8 }
 0x237   :  { %v219_v18 = vpop.trf.xlu1 }
 0x238   :  { %348 = vmatmul.mubr.msk.f32.vlgmr.msra.gmra.mrb[2].mxu1 %vm120_vm2, %v219_v18 }
 0x30b   :  { %v304_v20 = vpop.f32.mrb[2].mxu1 }
 0x30c   :  { %v305_v21 = vadd.f32 %v327_v19, %v304_v20  ;;  %v349_v22 = vpop.f32.mrb[3].mxu1 }
 0x30e   :  { %v308_v23 = vmax.f32 %v305_v21, 0.0 }
 0x310   :  { %309 = vst.msk [vmem:[#allocation2] sm:$0xff] %vm35_vm0, %v308_v23 }
 0x311   :  { %366 = shalt.err (!%p363_p4)
}
 0x312   :  { %s367_s6 = scalar_lea.hbm %s469_s7, 128 }
 0x313   :  { %p368_p5 = scmp.ne.s32.totalorder %s469_s7, %s367_s6  ;;  %p371_p6 = scmp.lt.u32.totalorder %s367_s6, %s469_s7 }
 0x315   :  { %p373_p7 = pnand %p371_p6, %p368_p5 }
 0x317   :  { %376 = shalt.err (!%p373_p7)
}
 0x318   :  { %319 = dma.vmem_to_hbm [thread:$0]  %s317_s11, 128, %s469_s7, [#allocation3]  }
 0x319   :  { %377 = dma.done.wait [#allocation3], 128  }
 0x31a   :  { %378 = vsyncadd [#allocation3], 4294967168 }
 0x31b   :  { %323 = vsyncpa [#allocation3], 1 }

</bundles_post_ra>
